<compile_context>
chip_gen: v5e
topology: v5e:2x2
jax: 0.10.0
libtpu: 0.0.40
codegen_flags: <defaults>
</compile_context>

<pallas_src>
import functools

import jax
import jax.numpy as jnp
from jax import lax
from jax.experimental import pallas as pl
from jax.experimental.pallas import tpu as pltpu


def _ce_label_smooth_kernel(x_ref, t_ref, o_ref, *, epsilon, num_classes):
    """One batch tile: logits (bB, C), labels (bB, 1) -> per-row losses (1, bB)."""
    x = x_ref[...].astype(jnp.float32)            # (bB, C) logits, f32 math
    t = t_ref[...]                                # (bB, 1) int32 labels

    # Numerically stable log-sum-exp along the class (lane) axis.
    m = jnp.max(x, axis=1, keepdims=True)                            # (bB, 1)
    lse = jnp.log(jnp.sum(jnp.exp(x - m), axis=1, keepdims=True))    # (bB, 1)

    # Fused weighted reduce:
    #   loss_row = (m + lse) - sum_j w_j * x_j
    #   w_j = eps/K + (1-eps) * [j == target]   (sum_j w_j == 1)
    k = jnp.float32(num_classes)
    eps = jnp.float32(epsilon)
    base = eps / k
    hot = (1.0 - eps) + base
    classes = lax.broadcasted_iota(jnp.int32, (1, x.shape[1]), 1)    # (1, C)
    w = jnp.where(classes == t, hot, base)                           # (bB, C)
    wx = jnp.sum(w * x, axis=1, keepdims=True)                       # (bB, 1)

    row_loss = (m + lse) - wx                                        # (bB, 1)
    # Lane-dense store: relayout (bB, 1) -> (1, bB) (tiny XLU pass, <= bB elems).
    o_ref[...] = jnp.reshape(row_loss, (1, row_loss.shape[0]))


def _vmem_capacity_bytes():
    try:
        info = pltpu.get_tpu_info()
        cap = getattr(info, "vmem_capacity_bytes", None)
        if cap:
            return int(cap)
    except Exception:
        pass
    return 128 << 20  # v5e / v6e default


def _vmem_limit_bytes():
    cap = _vmem_capacity_bytes()
    # 128 MiB physical (v5e/v6e) -> 64 MiB scoped; 64 MiB per-TC (v7x) -> 48 MiB.
    return int(min(64 << 20, (cap * 3) // 4))


def _pick_block_b(B, C, itemsize, vmem_budget_bytes):
    """Batch tile: multiple of 128 (lane-dense output) or the whole batch."""
    # Per-step VMEM working set ~= 2x input block (double buffer)
    # + ~4x f32-sized temporaries (f32 upcast, exp, weights, products).
    bytes_per_row = C * (2 * itemsize + 4 * 4)
    bb = int(vmem_budget_bytes // max(1, bytes_per_row))
    bb = min(bb, 2048)
    bb = (bb // 128) * 128
    if bb < 128:
        # TODO(synk): huge num_classes -> add C-axis grid with online LSE so
        # blocks fit v7x's 64 MiB VMEM; until then fall back to 128 rows.
        bb = 128
    if B >= 256:
        # Keep >= 2 blocks so the "parallel" batch axis feeds both v7x cores.
        half_rounded = ((((B + 1) // 2) + 127) // 128) * 128
        bb = min(bb, half_rounded)
    return B if bb >= B else bb


def cross_entropy_label_smooth(inputs, targets, *, num_classes, epsilon=0.1,
                               block_rows=None):
    """inputs: (B, C) float logits (f32 or bf16); targets: (B,) int class ids."""
    B, C = inputs.shape
    assert C == num_classes

    vmem_limit = _vmem_limit_bytes()
    if block_rows is None:
        itemsize = jnp.dtype(inputs.dtype).itemsize
        block_rows = _pick_block_b(B, C, itemsize, vmem_limit - (8 << 20))
    bB = int(block_rows)
    num_blocks = pl.cdiv(B, bB)

    t2d = targets.astype(jnp.int32).reshape(B, 1)

    kernel = functools.partial(
        _ce_label_smooth_kernel,
        epsilon=float(epsilon),
        num_classes=int(num_classes),
    )

    # NOTE: pipeline_mode=pl.Buffered(3) on the logits spec is a possible extra
    # win once DMA is exposed; left at the default double buffering here.
    row_losses = pl.pallas_call(
        kernel,
        out_shape=jax.ShapeDtypeStruct((1, B), jnp.float32),
        grid=(num_blocks,),
        in_specs=[
            pl.BlockSpec((bB, C), lambda i: (i, 0)),   # logits tile (streamed)
            pl.BlockSpec((bB, 1), lambda i: (i, 0)),   # labels tile
        ],
        out_specs=pl.BlockSpec((1, bB), lambda i: (0, i)),  # lane-dense losses
        compiler_params=pltpu.CompilerParams(
            dimension_semantics=("parallel",),          # shard batch tiles on v7x
            vmem_limit_bytes=vmem_limit,
        ),
    )(inputs, t2d)

    # Finalize in the wrapper: sum the B per-row losses, divide by global B.
    return jnp.sum(row_losses) / jnp.float32(B)


def _reference(inputs, targets, *, num_classes, epsilon=0.1):
    log_probs = jax.nn.log_softmax(inputs.astype(jnp.float32), axis=1)
    onehot = jax.nn.one_hot(targets, num_classes, dtype=jnp.float32)
    t = (1.0 - epsilon) * onehot + epsilon / num_classes
    return (-t * log_probs).mean(0).sum()


if __name__ == "__main__":
    key = jax.random.PRNGKey(0)
    k1, k2, k3, k4 = jax.random.split(key, 4)

    # Small canonical case (single block).
    batch, num_classes = 8, 32
    inputs = jax.random.normal(k1, (batch, num_classes), dtype=jnp.float32)
    targets = jax.random.randint(k2, (batch,), 0, num_classes, dtype=jnp.int32)

    loss = cross_entropy_label_smooth(inputs, targets,
                                      num_classes=num_classes, epsilon=0.1)
    loss = jax.block_until_ready(loss)
    ref = _reference(inputs, targets, num_classes=num_classes, epsilon=0.1)
    assert jnp.allclose(loss, ref, atol=1e-4, rtol=1e-4), (loss, ref)

    # Ragged multi-block case (exercises the padded last tile + masked stores).
    batch2, num_classes2 = 300, 272
    inputs2 = jax.random.normal(k3, (batch2, num_classes2), dtype=jnp.float32)
    targets2 = jax.random.randint(k4, (batch2,), 0, num_classes2, dtype=jnp.int32)

    loss2 = cross_entropy_label_smooth(inputs2, targets2,
                                       num_classes=num_classes2, epsilon=0.1,
                                       block_rows=128)
    loss2 = jax.block_until_ready(loss2)
    ref2 = _reference(inputs2, targets2, num_classes=num_classes2, epsilon=0.1)
    assert jnp.allclose(loss2, ref2, atol=1e-4, rtol=1e-4), (loss2, ref2)

    print("KERNEL_OK")
</pallas_src>

<mosaic_0001>
module attributes {stable_mosaic.version = 11 : i64} {
  func.func @_ce_label_smooth_kernel(%arg0: i32, %arg1: memref<8x32xf32, #tpu.memory_space<vmem>>, %arg2: memref<8x1xi32, #tpu.memory_space<vmem>>, %arg3: memref<1x8xf32, #tpu.memory_space<vmem>>) attributes {dimension_semantics = [#tpu.dimension_semantics<parallel>], iteration_bounds = array<i64: 1>, scalar_prefetch = 0 : i64, scratch_operands = 0 : i64, tpu.core_type = #tpu.core_type<tc>, window_params = [{transform_indices = @transform_0, window_bounds = array<i64: 8, 32>}, {transform_indices = @transform_1, window_bounds = array<i64: 8, 1>}, {transform_indices = @transform_2, window_bounds = array<i64: 1, 8>}]} {
    %c0 = arith.constant 0 : index
    %c0_0 = arith.constant 0 : index
    %0 = vector.load %arg1[%c0, %c0_0] : memref<8x32xf32, #tpu.memory_space<vmem>>, vector<8x32xf32>
    %c0_1 = arith.constant 0 : index
    %c0_2 = arith.constant 0 : index
    %1 = vector.load %arg2[%c0_1, %c0_2] : memref<8x1xi32, #tpu.memory_space<vmem>>, vector<8x1xi32>
    %cst = arith.constant dense<0xFF800000> : vector<8xf32>
    %2 = vector.multi_reduction <maximumf>, %0, %cst [1] : vector<8x32xf32> to vector<8xf32>
    %3 = vector.shape_cast %2 : vector<8xf32> to vector<8x1xf32>
    %4 = vector.broadcast %3 : vector<8x1xf32> to vector<8x32xf32>
    %5 = arith.subf %0, %4 : vector<8x32xf32>
    %6 = math.exp %5 : vector<8x32xf32>
    %cst_3 = arith.constant dense<0.000000e+00> : vector<8xf32>
    %7 = vector.multi_reduction <add>, %6, %cst_3 [1] : vector<8x32xf32> to vector<8xf32>
    %8 = vector.shape_cast %7 : vector<8xf32> to vector<8x1xf32>
    %9 = math.log %8 : vector<8x1xf32>
    %cst_4 = arith.constant 1.000000e-01 : f32
    %cst_5 = arith.constant 3.200000e+01 : f32
    %10 = arith.divf %cst_4, %cst_5 : f32
    %cst_6 = arith.constant 1.000000e+00 : f32
    %cst_7 = arith.constant 1.000000e-01 : f32
    %11 = arith.subf %cst_6, %cst_7 : f32
    %12 = arith.addf %11, %10 : f32
    %13 = tpu.iota {dimensions = array<i32: 1>} : vector<1x32xi32>
    %14 = vector.broadcast %13 : vector<1x32xi32> to vector<8x32xi32>
    %15 = vector.broadcast %1 : vector<8x1xi32> to vector<8x32xi32>
    %16 = arith.cmpi eq, %14, %15 : vector<8x32xi32>
    %17 = vector.broadcast %12 : f32 to vector<8x32xf32>
    %18 = vector.broadcast %10 : f32 to vector<8x32xf32>
    %19 = arith.select %16, %17, %18 : vector<8x32xi1>, vector<8x32xf32>
    %20 = arith.mulf %19, %0 : vector<8x32xf32>
    %cst_8 = arith.constant dense<0.000000e+00> : vector<8xf32>
    %21 = vector.multi_reduction <add>, %20, %cst_8 [1] : vector<8x32xf32> to vector<8xf32>
    %22 = vector.shape_cast %21 : vector<8xf32> to vector<8x1xf32>
    %23 = arith.addf %3, %9 : vector<8x1xf32>
    %24 = arith.subf %23, %22 : vector<8x1xf32>
    %25 = vector.shape_cast %24 : vector<8x1xf32> to vector<1x8xf32>
    %c0_9 = arith.constant 0 : index
    %c0_10 = arith.constant 0 : index
    %26 = vector.load %arg3[%c0_9, %c0_10] : memref<1x8xf32, #tpu.memory_space<vmem>>, vector<1x8xf32>
    tpu.vector_store %arg3[%c0_9, %c0_10], %25 {strides = array<i32>} : memref<1x8xf32, #tpu.memory_space<vmem>>, vector<1x8xf32>,
    return
  }
  func.func @transform_0(%arg0: i32) -> (i32, i32) {
    %c0_i32 = arith.constant 0 : i32
    %c0_i32_0 = arith.constant 0 : i32
    return %arg0, %c0_i32 : i32, i32
  }
  func.func @transform_1(%arg0: i32) -> (i32, i32) {
    %c0_i32 = arith.constant 0 : i32
    %c0_i32_0 = arith.constant 0 : i32
    return %arg0, %c0_i32 : i32, i32
  }
  func.func @transform_2(%arg0: i32) -> (i32, i32) {
    %c0_i32 = arith.constant 0 : i32
    %c0_i32_0 = arith.constant 0 : i32
    return %c0_i32, %arg0 : i32, i32
  }
}

</mosaic_0001>

<bundles_post_ra>
// kernel: tpu_custom_call.1
= control target key start
LH: loop header
LB: loop body
LE: loop exit
PB: predicated region body
PF: predicated region fallthrough
CT: control target
= control target key end

     0   :  { %vm14_vm0 = vcmask 261120   ;;  %s124_s0 = inlined_call_operand.vmem [shape: f32[8,32], index: 0, kind: input, shape index: {}]   ;;  %s125_s1 = inlined_call_operand.vmem [shape: s32[8,1], index: 1, kind: input, shape index: {}]   ;;  %s126_s2 = inlined_call_operand.hbm [shape: f32[1,8], index: 2, kind: output, shape index: {}]  }
   0x1   :  { %v12_v0 = vld [vmem:[%s124_s0] sm:$0xff] }
   0x2   :  { %7 = vsyncpa [#allocation3], 0  ;;  %v15_v1 = vsel %vm14_vm0, %v12_v0, -inf  ;;  %v94_v2 = vmov 0   ;;  %v13_v3 = vld [vmem:[%s125_s1] sm:$0xff]  ;;  %v26_v9 = vlaneseq  ;;  %s96_s0 = smov [#allocation2]  }
   0x3   :  { %63 = vset.pattern.permute.xlu0 %v94_v2  ;;  %v95_v12 = vmov 0.003125   ;;  %s49_s1 = sshll.u32 %s96_s0, 4  ;;  %s51_s15 = sshll.u32 %s126_s2, 4  ;;  %vm42_vm2 = vcmask 57344   ;;  %s50_s1 = int_to_ptr.vmem [resolvable:$true] %s49_s1  ;;  %s52_s15 = int_to_ptr.hbm [resolvable:$true] %s51_s15 }
   0x4   :  { %16 = vmax.xlane.f32.xlu0 %v15_v1  ;;  %v27_v10 = vand.u32 127, %v26_v9 }
  0x18   :  { %29 = vperm.xlu0 %63, %v13_v3  }
  0x77   :  { %v17_v4 = vpop.xlane.xlu0 %16 }
  0x78   :  { %v18_v5 = vsub.f32 %v12_v0, %v17_v4 }
  0x7a   :  { %v19_v6 = vmul.f32 1.442695, %v18_v5 }
  0x7c   :  { %64 = vpow2.f32 %v19_v6 }
  0x82   :  { %v65_v7 = vpop.eup %64 }
  0x83   :  { %v21_v8 = vsel %vm14_vm0, %v65_v7, 0.0 }
  0x84   :  { %22 = vadd.xlane.f32.xlu1 %v21_v8 }
  0x8a   :  { %v30_v11 = vpop.permute.xlu0 %29 }
  0x8b   :  { %vm31_vm1 = vcmp.eq.s32.totalorder %v27_v10, %v30_v11 }
  0x8c   :  { %v32_v13 = vsel %vm31_vm1, 0.903125, %v95_v12 }
  0x8d   :  { %v33_v14 = vmul.f32 %v32_v13, %v12_v0 }
  0x8f   :  { %v34_v15 = vsel %vm14_vm0, %v33_v14, 0.0 }
  0x90   :  { %35 = vadd.xlane.f32.xlu1 %v34_v15 }
  0xf7   :  { %v23_v16 = vpop.xlane.xlu1 %22 }
  0xf8   :  { %66 = vlog2.f32 %v23_v16 }
  0xfe   :  { %v67_v17 = vpop.eup %66 }
  0xff   :  { %v25_v18 = vmul.f32 0.6931472, %v67_v17 }
 0x101   :  { %v37_v19 = vadd.f32 %v25_v18, %v17_v4 }
 0x103   :  { %v36_v20 = vpop.xlane.xlu1 %35 }
 0x104   :  { %v38_v21 = vsub.f32 %v37_v19, %v36_v20 }
 0x106   :  { %v40_v22 = vperm.slane %v38_v21, %v27_v10 }
 0x108   :  { %43 = vst.msk [vmem:[#allocation2] sm:$0x1] %vm42_vm2, %v40_v22 }
 0x109   :  { %54 = dma.vmem_to_hbm [thread:$0]  %s50_s1, 16, %s52_s15, [#allocation3]  }
 0x10a   :  { %92 = dma.done.wait [#allocation3], 16  }
 0x10b   :  { %93 = vsyncadd [#allocation3], 4294967280 }
 0x10c   :  { %59 = vsyncpa [#allocation3], 1 }

</bundles_post_ra>
